<compile_context>
chip_gen: v7x
topology: tpu7x:2x2x1
jax: 0.10.0
libtpu: 0.0.40
codegen_flags: <defaults>
</compile_context>

<pallas_src>
import functools
import math

import jax
import jax.numpy as jnp
from jax.experimental import pallas as pl
from jax.experimental.pallas import tpu as pltpu


def _round_up(x, m):
    return (x + m - 1) // m * m


# ---------------------------------------------------------------------------
# Backend 1: in-kernel gather (preferred -- reads each feature row from HBM once)
# ---------------------------------------------------------------------------
def _gather_conv_kernel(kmap_ref, feats_ref, w_ref, b_ref, o_ref):
    """Per voxel tile: gather K neighbor rows from the VMEM-resident feature
    table and accumulate K per-tap MXU matmuls in f32.

    kmap_ref : (K, tile_n) int32            neighbor row per tap (sentinel -> zero row)
    feats_ref: (n_tbl, c_in_pad) f32        resident feature table (+ zero sentinel rows)
    w_ref    : (K, c_in_pad, c_out_pad) bf16  resident per-tap weights
    b_ref    : (1, c_out_pad) f32           resident bias
    o_ref    : (tile_n, c_out_pad) out_dtype
    """
    num_taps = kmap_ref.shape[0]
    feats = feats_ref[...]  # resident table, loaded once

    def body(k, acc):
        idx = kmap_ref[k, :]                               # (tile_n,) int32
        g = jnp.take(feats, idx, axis=0, mode="clip")      # (tile_n, c_in_pad) f32
        return acc + jnp.dot(g.astype(jnp.bfloat16), w_ref[k],
                             preferred_element_type=jnp.float32)

    acc = jax.lax.fori_loop(0, num_taps, body,
                            jnp.zeros(o_ref.shape, jnp.float32))
    o_ref[...] = (acc + b_ref[...]).astype(o_ref.dtype)


def sparse_conv3d_gather_pallas(kmap, feats_tbl, w_k, bias2d, *, tile_n=128,
                                out_dtype=jnp.bfloat16):
    """kmap: (K, n_pad) int32; feats_tbl: (n_tbl, c_in_pad) f32; w_k:
    (K, c_in_pad, c_out_pad) bf16; bias2d: (1, c_out_pad) f32.
    Returns (n_pad, c_out_pad) in out_dtype.

    For production sizes raise tile_n to 1024-2048 (128-multiples).  The whole
    feature table is kept VMEM-resident here; see the slab TODO above for
    large N."""
    num_taps, n_pad = kmap.shape
    n_tbl, c_in_pad = feats_tbl.shape
    kw, c_in_pad_w, c_out_pad = w_k.shape
    assert kw == num_taps and c_in_pad_w == c_in_pad
    assert tile_n % 128 == 0 and n_pad % tile_n == 0
    assert c_in_pad % 128 == 0 and c_out_pad % 128 == 0 and n_tbl % 8 == 0

    return pl.pallas_call(
        _gather_conv_kernel,
        out_shape=jax.ShapeDtypeStruct((n_pad, c_out_pad), out_dtype),
        grid_spec=pltpu.PrefetchScalarGridSpec(
            num_scalar_prefetch=0,
            grid=(n_pad // tile_n,),
            in_specs=[
                # per-tile slice of the kernel map (lane-dense int32)
                pl.BlockSpec((num_taps, tile_n), lambda i: (0, i)),
                # constant block index -> feature table resident in VMEM
                pl.BlockSpec((n_tbl, c_in_pad), lambda i: (0, 0)),
                # resident per-tap weights
                pl.BlockSpec((num_taps, c_in_pad, c_out_pad),
                             lambda i: (0, 0, 0)),
                # resident bias
                pl.BlockSpec((1, c_out_pad), lambda i: (0, 0)),
            ],
            out_specs=pl.BlockSpec((tile_n, c_out_pad), lambda i: (i, 0)),
        ),
        compiler_params=pltpu.CompilerParams(
            dimension_semantics=("parallel",),
        ),
    )(kmap, feats_tbl, w_k, bias2d)


# ---------------------------------------------------------------------------
# Backend 2: pre-gathered K-fused implicit GEMM (known-good fallback)
# ---------------------------------------------------------------------------
def _igemm_conv_kernel(g_ref, w_ref, b_ref, o_ref):
    """One fused MXU matmul per voxel tile: (tile_n, KC_pad) @ (KC_pad, C_out_pad)."""
    acc = jnp.dot(g_ref[...], w_ref[...], preferred_element_type=jnp.float32)
    o_ref[...] = (acc + b_ref[...]).astype(o_ref.dtype)


def sparse_conv3d_igemm_pallas(gathered_flat, w_flat, bias2d, *, tile_n=128,
                               out_dtype=jnp.bfloat16):
    n_pad, kc_pad = gathered_flat.shape
    kc_pad_w, c_out_pad = w_flat.shape
    assert kc_pad == kc_pad_w
    assert tile_n % 128 == 0 and n_pad % tile_n == 0
    assert kc_pad % 128 == 0 and c_out_pad % 128 == 0

    return pl.pallas_call(
        _igemm_conv_kernel,
        out_shape=jax.ShapeDtypeStruct((n_pad, c_out_pad), out_dtype),
        grid_spec=pltpu.PrefetchScalarGridSpec(
            num_scalar_prefetch=0,
            grid=(n_pad // tile_n,),
            in_specs=[
                pl.BlockSpec((tile_n, kc_pad), lambda i: (i, 0)),
                pl.BlockSpec((kc_pad, c_out_pad), lambda i: (0, 0)),
                pl.BlockSpec((1, c_out_pad), lambda i: (0, 0)),
            ],
            out_specs=pl.BlockSpec((tile_n, c_out_pad), lambda i: (i, 0)),
        ),
        compiler_params=pltpu.CompilerParams(
            dimension_semantics=("parallel",),
        ),
    )(gathered_flat, w_flat, bias2d)


# ---------------------------------------------------------------------------
# Host/JAX glue (kernel map + padding/layout), fully jitted
# ---------------------------------------------------------------------------
def build_kernel_map(coords, grid_size, kernel_size, num_voxels):
    """Sparse-conv kernel map (stride 1, out_grid == in_grid): for every active
    voxel and kernel tap, the index of the input neighbor voxel, or the
    sentinel `num_voxels` (a zero row) if that neighbor is inactive.
    Coordinates must be unique (duplicates would corrupt the scatter).
    Returns int32 (K, N)."""
    n = num_voxels
    d = grid_size
    pad = tuple((k - 1) // 2 for k in kernel_size)

    flat = coords[:, 0] * d * d + coords[:, 1] * d + coords[:, 2]
    index_vol = (jnp.full((d * d * d,), n, dtype=jnp.int32)
                 .at[flat].set(jnp.arange(n, dtype=jnp.int32)))

    taps = []
    for o0 in range(kernel_size[0]):
        for o1 in range(kernel_size[1]):
            for o2 in range(kernel_size[2]):
                off = jnp.array([o0 - pad[0], o1 - pad[1], o2 - pad[2]],
                                dtype=jnp.int32)
                nbr = coords + off
                in_bounds = jnp.all((nbr >= 0) & (nbr < d), axis=1)
                nbr_c = jnp.clip(nbr, 0, d - 1)
                nbr_flat = nbr_c[:, 0] * d * d + nbr_c[:, 1] * d + nbr_c[:, 2]
                taps.append(jnp.where(in_bounds, index_vol[nbr_flat], n)
                            .astype(jnp.int32))
    return jnp.stack(taps, axis=0)  # (K, N)


@functools.partial(jax.jit, static_argnames=("tile_n", "out_dtype"))
def sparse_conv3d_forward_gather(feats, kmap, weight, bias, *, tile_n=128,
                                 out_dtype=jnp.bfloat16):
    """Jitted glue + Pallas hot path, in-kernel-gather backend."""
    n, c_in = feats.shape
    num_taps = kmap.shape[0]
    c_out = weight.shape[0]
    c_in_pad = _round_up(c_in, 128)
    c_out_pad = _round_up(c_out, 128)
    n_pad = _round_up(n, tile_n)
    # Feature table with a zero sentinel row at index n; keep the row count
    # sublane-aligned (and >= tile_n) so the in-kernel gather stays on a
    # friendly (8,128)-tiled f32 layout.
    n_tbl = max(_round_up(n + 1, 8), tile_n)

    feats_tbl = jnp.pad(feats.astype(jnp.float32),
                        ((0, n_tbl - n), (0, c_in_pad - c_in)))
    kmap_p = jnp.pad(kmap, ((0, 0), (0, n_pad - n)), constant_values=n)
    # (C_out, C_in, k0, k1, k2) -> (K, C_in, C_out), tap-major to match the kmap.
    w_k = jnp.transpose(weight, (2, 3, 4, 1, 0)).reshape(num_taps, c_in, c_out)
    w_k = jnp.pad(w_k, ((0, 0), (0, c_in_pad - c_in),
                        (0, c_out_pad - c_out))).astype(jnp.bfloat16)
    bias2d = jnp.pad(bias, (0, c_out_pad - c_out)).astype(jnp.float32)[None, :]

    out_pad = sparse_conv3d_gather_pallas(kmap_p, feats_tbl, w_k, bias2d,
                                          tile_n=tile_n, out_dtype=out_dtype)
    return out_pad[:n, :c_out]


@functools.partial(jax.jit, static_argnames=("tile_n", "out_dtype"))
def sparse_conv3d_forward_igemm(feats, kmap, weight, bias, *, tile_n=128,
                                out_dtype=jnp.bfloat16):
    """Jitted glue + Pallas hot path, pre-gathered implicit-GEMM fallback."""
    n, c_in = feats.shape
    num_taps = kmap.shape[0]
    c_out = weight.shape[0]
    kc = num_taps * c_in
    kc_pad = _round_up(kc, 128)
    c_out_pad = _round_up(c_out, 128)
    n_pad = _round_up(n, tile_n)

    # bf16 BEFORE the gather: halves HBM traffic of the K-fold expansion.
    feats_b = jnp.concatenate(
        [feats.astype(jnp.bfloat16), jnp.zeros((1, c_in), jnp.bfloat16)], axis=0)
    gathered = jnp.transpose(feats_b[kmap], (1, 0, 2)).reshape(n, kc)
    gathered = jnp.pad(gathered, ((0, n_pad - n), (0, kc_pad - kc)))

    w_flat = jnp.transpose(weight, (2, 3, 4, 1, 0)).reshape(kc, c_out)
    w_flat = jnp.pad(w_flat, ((0, kc_pad - kc),
                              (0, c_out_pad - c_out))).astype(jnp.bfloat16)
    bias2d = jnp.pad(bias, (0, c_out_pad - c_out)).astype(jnp.float32)[None, :]

    out_pad = sparse_conv3d_igemm_pallas(gathered, w_flat, bias2d,
                                         tile_n=tile_n, out_dtype=out_dtype)
    return out_pad[:n, :c_out]


if __name__ == "__main__":
    key = jax.random.PRNGKey(0)

    # SparseConv3d(in_channels=32, out_channels=64, kernel_size=3, stride=1, bias=True)
    c_in, c_out = 32, 64
    kernel_size = (3, 3, 3)
    K = math.prod(kernel_size)

    # Small synthetic sparse VDB grid: 100 active voxels in an 8^3 volume.
    D, N = 8, 100
    TILE_N = 128                 # demo-sized; 1024-2048 for production voxel counts
    OUT_DTYPE = jnp.bfloat16     # half-width lane-dense HBM stores (review item)

    k_coord, k_feat, k_w, k_b = jax.random.split(key, 4)
    flat_ids = jax.random.choice(k_coord, D * D * D, shape=(N,), replace=False)
    coords = jnp.stack(jnp.unravel_index(flat_ids, (D, D, D)), axis=1).astype(jnp.int32)
    feats = jax.random.normal(k_feat, (N, c_in), dtype=jnp.float32)

    # reset_parameters(): uniform(-std, std), std = 1/sqrt(in_channels * kernel_volume)
    std = 1.0 / math.sqrt(c_in * K)
    weight = jax.random.uniform(k_w, (c_out, c_in) + kernel_size, jnp.float32, -std, std)
    bias = jax.random.uniform(k_b, (c_out,), jnp.float32, -std, std)

    # Host/JAX glue: equivalent of grid.sparse_conv_kernel_map (unique coords).
    kmap = build_kernel_map(coords, D, kernel_size, N)  # (K, N) int32

    # Preferred backend: in-kernel gather (each feature row read from HBM once).
    # If the gather lowering is unavailable on this toolchain, fall back to the
    # pre-gathered implicit GEMM (mirrors fvdb's own backend fallback).
    try:
        out = jax.block_until_ready(
            sparse_conv3d_forward_gather(feats, kmap, weight, bias,
                                         tile_n=TILE_N, out_dtype=OUT_DTYPE))
    except Exception:
        out = jax.block_until_ready(
            sparse_conv3d_forward_igemm(feats, kmap, weight, bias,
                                        tile_n=TILE_N, out_dtype=OUT_DTYPE))

    # Reference with identical bf16-rounded operands and f32 accumulation.
    # NOTE: matches a true fp32 PyTorch SparseConv3d only to ~bf16 precision;
    # keep operands f32 end-to-end if strict parity is required.
    feats_sent = jnp.concatenate([feats, jnp.zeros((1, c_in), feats.dtype)], axis=0)
    gathered_ref = jnp.transpose(feats_sent[kmap], (1, 0, 2)).reshape(N, K * c_in)
    w2d = jnp.transpose(weight, (2, 3, 4, 1, 0)).reshape(K * c_in, c_out)
    ref = (gathered_ref.astype(jnp.bfloat16).astype(jnp.float32)
           @ w2d.astype(jnp.bfloat16).astype(jnp.float32) + bias[None, :])

    assert out.shape == (N, c_out)
    assert jnp.allclose(out.astype(jnp.float32), ref, atol=3e-2, rtol=3e-2)
    print("KERNEL_OK")
</pallas_src>

<mosaic_0001>
module attributes {stable_mosaic.version = 11 : i64} {
  func.func @_igemm_conv_kernel(%arg0: i32, %arg1: memref<128x896xbf16, #tpu.memory_space<vmem>>, %arg2: memref<896x128xbf16, #tpu.memory_space<vmem>>, %arg3: memref<1x128xf32, #tpu.memory_space<vmem>>, %arg4: memref<128x128xbf16, #tpu.memory_space<vmem>>) attributes {dimension_semantics = [#tpu.dimension_semantics<parallel>], iteration_bounds = array<i64: 1>, scalar_prefetch = 0 : i64, scratch_operands = 0 : i64, tpu.core_type = #tpu.core_type<tc>, window_params = [{transform_indices = @transform_0, window_bounds = array<i64: 128, 896>}, {pipeline_mode = #tpu.pipeline_mode<synchronous>, transform_indices = @transform_1, window_bounds = array<i64: 896, 128>}, {pipeline_mode = #tpu.pipeline_mode<synchronous>, transform_indices = @transform_2, window_bounds = array<i64: 1, 128>}, {transform_indices = @transform_3, window_bounds = array<i64: 128, 128>}]} {
    %c0 = arith.constant 0 : index
    %c0_0 = arith.constant 0 : index
    %0 = vector.load %arg1[%c0, %c0_0] : memref<128x896xbf16, #tpu.memory_space<vmem>>, vector<128x896xbf16>
    %c0_1 = arith.constant 0 : index
    %c0_2 = arith.constant 0 : index
    %1 = vector.load %arg2[%c0_1, %c0_2] : memref<896x128xbf16, #tpu.memory_space<vmem>>, vector<896x128xbf16>
    %cst = arith.constant dense<0.000000e+00> : vector<128x128xf32>
    %2 = tpu.matmul %0, %1, %cst {dimension_numbers = #tpu.dot_dimension_numbers<[1], [0], [0], [1], [0, 0, 1, 1], [], []>} : vector<128x896xbf16>, vector<896x128xbf16>, vector<128x128xf32> -> vector<128x128xf32>
    %c0_3 = arith.constant 0 : index
    %c0_4 = arith.constant 0 : index
    %3 = vector.load %arg3[%c0_3, %c0_4] : memref<1x128xf32, #tpu.memory_space<vmem>>, vector<1x128xf32>
    %4 = vector.broadcast %3 : vector<1x128xf32> to vector<128x128xf32>
    %5 = arith.addf %2, %4 : vector<128x128xf32>
    %6 = arith.truncf %5 : vector<128x128xf32> to vector<128x128xbf16>
    %c0_5 = arith.constant 0 : index
    %c0_6 = arith.constant 0 : index
    %7 = vector.load %arg4[%c0_5, %c0_6] : memref<128x128xbf16, #tpu.memory_space<vmem>>, vector<128x128xbf16>
    tpu.vector_store %arg4[%c0_5, %c0_6], %6 {strides = array<i32>} : memref<128x128xbf16, #tpu.memory_space<vmem>>, vector<128x128xbf16>,
    return
  }
  func.func @transform_0(%arg0: i32) -> (i32, i32) {
    %c0_i32 = arith.constant 0 : i32
    %c0_i32_0 = arith.constant 0 : i32
    return %arg0, %c0_i32 : i32, i32
  }
  func.func @transform_1(%arg0: i32) -> (i32, i32) {
    %c0_i32 = arith.constant 0 : i32
    %c0_i32_0 = arith.constant 0 : i32
    %c0_i32_1 = arith.constant 0 : i32
    return %c0_i32, %c0_i32_0 : i32, i32
  }
  func.func @transform_2(%arg0: i32) -> (i32, i32) {
    %c0_i32 = arith.constant 0 : i32
    %c0_i32_0 = arith.constant 0 : i32
    %c0_i32_1 = arith.constant 0 : i32
    return %c0_i32, %c0_i32_0 : i32, i32
  }
  func.func @transform_3(%arg0: i32) -> (i32, i32) {
    %c0_i32 = arith.constant 0 : i32
    %c0_i32_0 = arith.constant 0 : i32
    return %arg0, %c0_i32 : i32, i32
  }
}

</mosaic_0001>

<bundles_post_ra>
// kernel: sparse_conv3d_forward_igemm.1
= control target key start
LH: loop header
LB: loop body
LE: loop exit
PB: predicated region body
PF: predicated region fallthrough
CT: control target
= control target key end

     0   :  { %s2311_s1 = inlined_call_operand.vmem [shape: bf16[896,128], index: 1, kind: input, shape index: {}]   ;;  %s2312_s0 = inlined_call_operand.vmem [shape: bf16[128,896], index: 0, kind: input, shape index: {}]   ;;  %s2313_s2 = inlined_call_operand.vmem [shape: f32[1,128], index: 2, kind: input, shape index: {}]   ;;  %s2314_s3 = inlined_call_operand.vmem [shape: bf16[128,128], index: 3, kind: output, shape index: {}]  }
   0x1   :  { %v1726_v0 = vld [vmem:[%s2311_s1 + $0x40] sm:$0xff]   ;;  %v1730_v4 = vld [vmem:[%s2311_s1 + $0x48] sm:$0xff]   ;;  %v1734_v8 = vld [vmem:[%s2311_s1 + $0x50] sm:$0xff]  }
   0x2   :  { %v1727_v1 = vld [vmem:[%s2311_s1] sm:$0xff]   ;;  %1486 = vmatprep.subr.bf16.mxu0 %v1726_v0  ;;  %v1731_v5 = vld [vmem:[%s2311_s1 + $0x8] sm:$0xff]   ;;  %v1735_v9 = vld [vmem:[%s2311_s1 + $0x10] sm:$0xff]  }
   0x3   :  { %v1728_v2 = vld [vmem:[%s2311_s1 + $0xc0] sm:$0xff]   ;;  %1487 = vmatpush3.bf16.msra.mxu0 %v1727_v1  ;;  %v1732_v6 = vld [vmem:[%s2311_s1 + $0xc8] sm:$0xff]   ;;  %v1736_v10 = vld [vmem:[%s2311_s1 + $0xd0] sm:$0xff]  }
   0x4   :  { %v1729_v3 = vld [vmem:[%s2311_s1 + $0x80] sm:$0xff]   ;;  %1550 = vmatprep.subr.bf16.mxu1 %v1728_v2  ;;  %1488 = vmatprep.subr.bf16.mxu0 %v1730_v4  ;;  %v1733_v7 = vld [vmem:[%s2311_s1 + $0x88] sm:$0xff]   ;;  %v1737_v11 = vld [vmem:[%s2311_s1 + $0x90] sm:$0xff]  }
   0x5   :  { %1551 = vmatpush3.bf16.msra.mxu1 %v1729_v3  ;;  %v1738_v12 = vld [vmem:[%s2311_s1 + $0x58] sm:$0xff]   ;;  %v1742_v16 = vld [vmem:[%s2311_s1 + $0x60] sm:$0xff]   ;;  %v1746_v20 = vld [vmem:[%s2311_s1 + $0x68] sm:$0xff]  }
   0x6   :  { %1552 = vmatprep.subr.bf16.mxu1 %v1732_v6  ;;  %v1739_v13 = vld [vmem:[%s2311_s1 + $0x18] sm:$0xff]   ;;  %v1743_v17 = vld [vmem:[%s2311_s1 + $0x20] sm:$0xff]   ;;  %v1747_v21 = vld [vmem:[%s2311_s1 + $0x28] sm:$0xff]  }
   0x7   :  { %1489 = vmatpush3.bf16.msra.mxu0 %v1731_v5  ;;  %v1740_v14 = vld [vmem:[%s2311_s1 + $0xd8] sm:$0xff]   ;;  %v1744_v18 = vld [vmem:[%s2311_s1 + $0xe0] sm:$0xff]   ;;  %v1748_v22 = vld [vmem:[%s2311_s1 + $0xe8] sm:$0xff]  }
   0x8   :  { %1490 = vmatprep.subr.bf16.mxu0 %v1734_v8  ;;  %v1741_v15 = vld [vmem:[%s2311_s1 + $0x98] sm:$0xff]   ;;  %v1745_v19 = vld [vmem:[%s2311_s1 + $0xa0] sm:$0xff]   ;;  %v1749_v23 = vld [vmem:[%s2311_s1 + $0xa8] sm:$0xff]  }
   0x9   :  { %1553 = vmatpush3.bf16.msra.mxu1 %v1733_v7  ;;  %v1750_v24 = vld [vmem:[%s2311_s1 + $0x70] sm:$0xff]   ;;  %v1754_v28 = vld [vmem:[%s2311_s1 + $0x78] sm:$0xff]   ;;  %v1759_v32 = vld [vmem:[%s2312_s0 + $0x4] ss:$28 sps:$4 sm:$0xff]  }
   0xa   :  { %1554 = vmatprep.subr.bf16.mxu1 %v1736_v10  ;;  %v1751_v25 = vld [vmem:[%s2311_s1 + $0x30] sm:$0xff]   ;;  %v1755_v29 = vld [vmem:[%s2311_s1 + $0x38] sm:$0xff]   ;;  %854 = vmatprep.mubr.bf16.mxu0 %v1759_v32  ;;  %v1761_v34 = vld [vmem:[%s2311_s1 + $0x140] sm:$0xff]  }
   0xb   :  { %1491 = vmatpush3.bf16.msra.mxu0 %v1735_v9  ;;  %v1752_v26 = vld [vmem:[%s2311_s1 + $0xf0] sm:$0xff]   ;;  %v1756_v30 = vld [vmem:[%s2311_s1 + $0xf8] sm:$0xff]   ;;  %v1762_v35 = vld [vmem:[%s2312_s0 + $0x8] ss:$28 sps:$4 sm:$0xff]  }
   0xc   :  { %1492 = vmatprep.subr.bf16.mxu0 %v1738_v12  ;;  %v1753_v27 = vld [vmem:[%s2311_s1 + $0xb0] sm:$0xff]   ;;  %v1757_v31 = vld [vmem:[%s2312_s0] ss:$28 sps:$4 sm:$0xff]   ;;  %v1764_v36 = vld [vmem:[%s2312_s0 + $0xc] ss:$28 sps:$4 sm:$0xff]  }
   0xd   :  { %1555 = vmatpush3.bf16.msra.mxu1 %v1737_v11  ;;  %v1760_v33 = vld [vmem:[%s2311_s1 + $0xb8] sm:$0xff]   ;;  %v1765_v37 = vld [vmem:[%s2311_s1 + $0x100] sm:$0xff]   ;;  %951 = vmatprep.mubr.bf16.mxu1 %v1764_v36  ;;  %v1769_v40 = vld [vmem:[%s2311_s1 + $0x148] sm:$0xff]  }
   0xe   :  { %1556 = vmatprep.subr.bf16.mxu1 %v1740_v14  ;;  %v1766_v38 = vld [vmem:[%s2312_s0 + $0x3c] ss:$28 sps:$4 sm:$0xff]   ;;  %v1770_v41 = vld [vmem:[%s2312_s0 + $0x44] ss:$28 sps:$4 sm:$0xff]   ;;  %v1772_v42 = vld [vmem:[%s2311_s1 + $0x108] sm:$0xff]  }
   0xf   :  { %1493 = vmatpush3.bf16.msra.mxu0 %v1739_v13  ;;  %v1768_v39 = vld [vmem:[%s2312_s0 + $0x38] ss:$28 sps:$4 sm:$0xff]   ;;  %v1773_v43 = vld [vmem:[%s2312_s0 + $0x40] ss:$28 sps:$4 sm:$0xff]   ;;  %v1776_v48 = vld [vmem:[%s2312_s0 + $0x70] ss:$28 sps:$4 sm:$0xff]  }
  0x10   :  { %1494 = vmatprep.subr.bf16.mxu0 %v1742_v16  ;;  %v1774_v44 = vld [vmem:[%s2312_s0 + $0x74] ss:$28 sps:$4 sm:$0xff]   ;;  %v1778_v46 = vld [vmem:[%s2312_s0 + $0x7c] ss:$28 sps:$4 sm:$0xff]   ;;  %v1782_v49 = vld [vmem:[%s2312_s0 + $0xac] ss:$28 sps:$4 sm:$0xff]  }
  0x11   :  { %1557 = vmatpush3.bf16.msra.mxu1 %v1741_v15  ;;  %v1777_v45 = vld [vmem:[%s2311_s1 + $0x150] sm:$0xff]   ;;  %v1785_v50 = vld [vmem:[%s2311_s1 + $0x158] sm:$0xff]   ;;  %v1793_v54 = vld [vmem:[%s2311_s1 + $0x160] sm:$0xff]  }
  0x12   :  { %1558 = vmatprep.subr.bf16.mxu1 %v1744_v18  ;;  %v1780_v47 = vld [vmem:[%s2311_s1 + $0x110] sm:$0xff]   ;;  %v1788_v52 = vld [vmem:[%s2311_s1 + $0x118] sm:$0xff]   ;;  %v1784_v55 = vld [vmem:[%s2312_s0 + $0xa8] ss:$28 sps:$4 sm:$0xff]  }
  0x13   :  { %1495 = vmatpush3.bf16.msra.mxu0 %v1743_v17  ;;  %v1781_v51 = vld [vmem:[%s2312_s0 + $0x78] ss:$28 sps:$4 sm:$0xff]   ;;  %v1796_v56 = vld [vmem:[%s2311_s1 + $0x120] sm:$0xff]   ;;  %v1789_v59 = vld [vmem:[%s2312_s0 + $0xb0] ss:$28 sps:$4 sm:$0xff]  }
  0x14   :  { %1496 = vmatprep.subr.bf16.mxu0 %v1746_v20  ;;  %v1786_v53 = vld [vmem:[%s2312_s0 + $0xb4] ss:$28 sps:$4 sm:$0xff]   ;;  %v1790_v57 = vld [vmem:[%s2312_s0 + $0xe4] ss:$28 sps:$4 sm:$0xff]   ;;  %v1794_v60 = vld [vmem:[%s2312_s0 + $0xec] ss:$28 sps:$4 sm:$0xff]  }
  0x15   :  { %1559 = vmatpush3.bf16.msra.mxu1 %v1745_v19  ;;  %v1798_v58 = vld [vmem:[%s2311_s1 + $0x180] sm:$0xff]   ;;  %v1802_v61 = vld [vmem:[%s2311_s1 + $0x168] sm:$0xff]   ;;  %v1808_v0 = vld [vmem:[%s2311_s1 + $0x190] sm:$0xff]  }
  0x16   :  { %1560 = vmatprep.subr.bf16.mxu1 %v1748_v22  ;;  %v1803_v62 = vld [vmem:[%s2311_s1 + $0x188] sm:$0xff]   ;;  %v1792_v1 = vld [vmem:[%s2312_s0 + $0xe0] ss:$28 sps:$4 sm:$0xff]   ;;  %v1812_v4 = vld [vmem:[%s2311_s1 + $0x170] sm:$0xff]  }
  0x17   :  { %1497 = vmatpush3.bf16.msra.mxu0 %v1747_v21  ;;  %v1806_v63 = vld [vmem:[%s2311_s1 + $0x128] sm:$0xff]   ;;  %v1799_v3 = vld [vmem:[%s2312_s0 + $0x11c] ss:$28 sps:$4 sm:$0xff]   ;;  %v1804_v6 = vld [vmem:[%s2312_s0 + $0x124] ss:$28 sps:$4 sm:$0xff]  }
  0x18   :  { %1498 = vmatprep.subr.bf16.mxu0 %v1750_v24  ;;  %v1797_v2 = vld [vmem:[%s2312_s0 + $0xe8] ss:$28 sps:$4 sm:$0xff]   ;;  %v1813_v5 = vld [vmem:[%s2311_s1 + $0x198] sm:$0xff]   ;;  %v1816_v7 = vld [vmem:[%s2311_s1 + $0x130] sm:$0xff]  }
  0x19   :  { %1561 = vmatpush3.bf16.msra.mxu1 %v1749_v23  ;;  %v1818_v8 = vld [vmem:[%s2311_s1 + $0x1a0] sm:$0xff]   ;;  %v1801_v9 = vld [vmem:[%s2312_s0 + $0x118] ss:$28 sps:$4 sm:$0xff]   ;;  %v1823_v13 = vld [vmem:[%s2311_s1 + $0x1a8] sm:$0xff]  }
  0x1a   :  { %1562 = vmatprep.subr.bf16.mxu1 %v1752_v26  ;;  %v1822_v10 = vld [vmem:[%s2311_s1 + $0x178] sm:$0xff]   ;;  %v1809_v12 = vld [vmem:[%s2312_s0 + $0x154] ss:$28 sps:$4 sm:$0xff]   ;;  %v1819_v18 = vld [vmem:[%s2312_s0 + $0x18c] ss:$28 sps:$4 sm:$0xff]  }
  0x1b   :  { %1499 = vmatpush3.bf16.msra.mxu0 %v1751_v25  ;;  %v1807_v11 = vld [vmem:[%s2312_s0 + $0x120] ss:$28 sps:$4 sm:$0xff]   ;;  %v1828_v16 = vld [vmem:[%s2311_s1 + $0x1b0] sm:$0xff]   ;;  %v1821_v22 = vld [vmem:[%s2312_s0 + $0x188] ss:$28 sps:$4 sm:$0xff]  }
  0x1c   :  { %1500 = vmatprep.subr.bf16.mxu0 %v1754_v28  ;;  %v1826_v14 = vld [vmem:[%s2311_s1 + $0x138] sm:$0xff]   ;;  %v1811_v17 = vld [vmem:[%s2312_s0 + $0x150] ss:$28 sps:$4 sm:$0xff]  }
  0x1d   :  { %1563 = vmatpush3.bf16.msra.mxu1 %v1753_v27  ;;  %v1814_v15 = vld [vmem:[%s2312_s0 + $0x15c] ss:$28 sps:$4 sm:$0xff]   ;;  %v1824_v21 = vld [vmem:[%s2312_s0 + $0x194] ss:$28 sps:$4 sm:$0xff]   ;;  %v1835_v27 = vld [vmem:[%s2312_s0 + $0x4c] ss:$28 sps:$4 sm:$0xff]  }
  0x1e   :  { %1564 = vmatprep.subr.bf16.mxu1 %v1756_v30  ;;  %v1832_v19 = vld [vmem:[%s2311_s1 + $0x1b8] sm:$0xff]   ;;  %v1831_v23 = vld [vmem:[%s2312_s0 + $0x14] ss:$28 sps:$4 sm:$0xff]   ;;  %v1837_v30 = vld [vmem:[%s2312_s0 + $0x48] ss:$28 sps:$4 sm:$0xff]  }
  0x1f   :  { %1501 = vmatpush3.bf16.msra.mxu0 %v1755_v29  ;;  %v1817_v20 = vld [vmem:[%s2312_s0 + $0x158] ss:$28 sps:$4 sm:$0xff]   ;;  %v1827_v24 = vld [vmem:[%s2312_s0 + $0x190] ss:$28 sps:$4 sm:$0xff]   ;;  %v1841_v29 = vld [vmem:[%s2312_s0 + $0x88] ss:$28 sps:$4 sm:$0xff]  }
  0x20   :  { %1614 = vmatprep.subr.bf16.mxu0 %v1761_v34  ;;  %v1833_v25 = vld [vmem:[%s2312_s0 + $0x18] ss:$28 sps:$4 sm:$0xff]   ;;  %v1829_v26 = vld [vmem:[%s2312_s0 + $0x10] ss:$28 sps:$4 sm:$0xff]   ;;  %v1842_v32 = vld [vmem:[%s2312_s0 + $0xc0] ss:$28 sps:$4 sm:$0xff]  }
  0x21   :  { %1565 = vmatpush3.bf16.msra.mxu1 %v1760_v33  ;;  %v1834_v28 = vld [vmem:[%s2312_s0 + $0x50] ss:$28 sps:$4 sm:$0xff]   ;;  %v1849_v33 = vld [vmem:[%s2312_s0 + $0xf8] ss:$28 sps:$4 sm:$0xff]   ;;  %v1840_v34 = vld [vmem:[%s2312_s0 + $0x80] ss:$28 sps:$4 sm:$0xff]  }
  0x22   :  { %855 = vmatmul.mubr.bf16.vlgmr.msra.gmra.mrb[0].mxu0 %v1757_v31  ;;  %1694 = vmatprep.subr.bf16.mxu1 %v1798_v58  ;;  %v1838_v31 = vld [vmem:[%s2312_s0 + $0x84] ss:$28 sps:$4 sm:$0xff]   ;;  %v1850_v36 = vld [vmem:[%s2312_s0 + $0x130] ss:$28 sps:$4 sm:$0xff]  }
  0x23   :  { %1615 = vmatpush3.bf16.msra.mxu0 %v1765_v37  ;;  %862 = vmatprep.mubr.bf16.mxu0 %v1766_v38  ;;  %v1857_v37 = vld [vmem:[%s2312_s0 + $0x168] ss:$28 sps:$4 sm:$0xff]   ;;  %v1845_v38 = vld [vmem:[%s2312_s0 + $0xb8] ss:$28 sps:$4 sm:$0xff]  }
  0x24   :  { %952 = vmatmul.mubr.bf16.vlgmr.msra.gmra.mrb[0].mxu1 %v1762_v35  ;;  %1616 = vmatprep.subr.bf16.mxu0 %v1769_v40  ;;  %v1843_v35 = vld [vmem:[%s2312_s0 + $0xbc] ss:$28 sps:$4 sm:$0xff]  }
  0x25   :  { %959 = vmatprep.mubr.bf16.mxu1 %v1770_v41  ;;  %1695 = vmatpush3.bf16.msra.mxu1 %v1798_v58  ;;  %v1858_v40 = vld [vmem:[%s2312_s0 + $0x1a0] ss:$28 sps:$4 sm:$0xff]   ;;  %v1848_v41 = vld [vmem:[%s2312_s0 + $0xf0] ss:$28 sps:$4 sm:$0xff]  }
  0x26   :  { %1696 = vmatprep.subr.bf16.mxu1 %v1803_v62 }
  0x27   :  { %1617 = vmatpush3.bf16.msra.mxu0 %v1772_v42  ;;  %v1851_v42 = vld [vmem:[%s2312_s0 + $0x12c] ss:$28 sps:$4 sm:$0xff]  }
  0x28   :  { %1618 = vmatprep.subr.bf16.mxu0 %v1777_v45  ;;  %v1856_v45 = vld [vmem:[%s2312_s0 + $0x160] ss:$28 sps:$4 sm:$0xff]  }
  0x29   :  { %1697 = vmatpush3.bf16.msra.mxu1 %v1803_v62 }
  0x2a   :  { %863 = vmatmul.mubr.bf16.gmra.mrb[4].mxu0 %v1768_v39  ;;  %1698 = vmatprep.subr.bf16.mxu1 %v1808_v0  ;;  %v1846_v39 = vld [vmem:[%s2312_s0 + $0xf4] ss:$28 sps:$4 sm:$0xff]  }
  0x2b   :  { %870 = vmatprep.mubr.bf16.mxu0 %v1774_v44  ;;  %1619 = vmatpush3.bf16.msra.mxu0 %v1780_v47  ;;  %v1854_v44 = vld [vmem:[%s2312_s0 + $0x164] ss:$28 sps:$4 sm:$0xff]   ;;  %v1861_v47 = vld [vmem:[%s2312_s0 + $0x198] ss:$28 sps:$4 sm:$0xff]  }
  0x2c   :  { %960 = vmatmul.mubr.bf16.gmra.mrb[4].mxu1 %v1773_v43  ;;  %1620 = vmatprep.subr.bf16.mxu0 %v1785_v50  ;;  %v1853_v43 = vld [vmem:[%s2312_s0 + $0x128] ss:$28 sps:$4 sm:$0xff]  }
  0x2d   :  { %967 = vmatprep.mubr.bf16.mxu1 %v1778_v46  ;;  %1699 = vmatpush3.bf16.msra.mxu1 %v1808_v0  ;;  %v1859_v46 = vld [vmem:[%s2312_s0 + $0x19c] ss:$28 sps:$4 sm:$0xff]  }
  0x2e   :  { %1700 = vmatprep.subr.bf16.mxu1 %v1813_v5 }
  0x2f   :  { %1621 = vmatpush3.bf16.msra.mxu0 %v1788_v52 }
  0x30   :  { %1622 = vmatprep.subr.bf16.mxu0 %v1793_v54 }
  0x31   :  { %1701 = vmatpush3.bf16.msra.mxu1 %v1813_v5 }
  0x32   :  { %871 = vmatmul.mubr.bf16.gmra.mrb[8].mxu0 %v1776_v48  ;;  %1702 = vmatprep.subr.bf16.mxu1 %v1818_v8 }
  0x33   :  { %878 = vmatprep.mubr.bf16.mxu0 %v1782_v49  ;;  %1623 = vmatpush3.bf16.msra.mxu0 %v1796_v56  ;;  %v2221_v49 = vld [vmem:[%s2313_s2] ss:$0 sm:$0xff] }
  0x34   :  { %968 = vmatmul.mubr.bf16.gmra.mrb[8].mxu1 %v1781_v51  ;;  %1624 = vmatprep.subr.bf16.mxu0 %v1802_v61 }
  0x35   :  { %975 = vmatprep.mubr.bf16.mxu1 %v1786_v53  ;;  %1703 = vmatpush3.bf16.msra.mxu1 %v1818_v8 }
  0x36   :  { %1704 = vmatprep.subr.bf16.mxu1 %v1823_v13 }
  0x37   :  { %1625 = vmatpush3.bf16.msra.mxu0 %v1806_v63 }
  0x38   :  { %1626 = vmatprep.subr.bf16.mxu0 %v1812_v4 }
  0x39   :  { %1705 = vmatpush3.bf16.msra.mxu1 %v1823_v13 }
  0x3a   :  { %879 = vmatmul.mubr.bf16.gmra.mrb[12].mxu0 %v1784_v55  ;;  %1706 = vmatprep.subr.bf16.mxu1 %v1828_v16 }
  0x3b   :  { %886 = vmatprep.mubr.bf16.mxu0 %v1790_v57  ;;  %1627 = vmatpush3.bf16.msra.mxu0 %v1816_v7 }
  0x3c   :  { %976 = vmatmul.mubr.bf16.gmra.mrb[12].mxu1 %v1789_v59  ;;  %1628 = vmatprep.subr.bf16.mxu0 %v1822_v10 }
  0x3d   :  { %983 = vmatprep.mubr.bf16.mxu1 %v1794_v60  ;;  %1707 = vmatpush3.bf16.msra.mxu1 %v1828_v16 }
  0x3e   :  { %1708 = vmatprep.subr.bf16.mxu1 %v1832_v19 }
  0x3f   :  { %1629 = vmatpush3.bf16.msra.mxu0 %v1826_v14 }
  0x41   :  { %1709 = vmatpush3.bf16.msra.mxu1 %v1832_v19 }
  0x42   :  { %887 = vmatmul.mubr.bf16.gmra.mrb[16].mxu0 %v1792_v1 }
  0x43   :  { %894 = vmatprep.mubr.bf16.mxu0 %v1799_v3 }
  0x44   :  { %984 = vmatmul.mubr.bf16.gmra.mrb[16].mxu1 %v1797_v2 }
  0x45   :  { %991 = vmatprep.mubr.bf16.mxu1 %v1804_v6 }
  0x4a   :  { %895 = vmatmul.mubr.bf16.gmra.mrb[20].mxu0 %v1801_v9 }
  0x4b   :  { %902 = vmatprep.mubr.bf16.mxu0 %v1809_v12 }
  0x4c   :  { %992 = vmatmul.mubr.bf16.gmra.mrb[20].mxu1 %v1807_v11 }
  0x4d   :  { %999 = vmatprep.mubr.bf16.mxu1 %v1814_v15 }
  0x52   :  { %903 = vmatmul.mubr.bf16.gmra.mrb[24].mxu0 %v1811_v17 }
  0x53   :  { %910 = vmatprep.mubr.bf16.mxu0 %v1819_v18 }
  0x54   :  { %1000 = vmatmul.mubr.bf16.gmra.mrb[24].mxu1 %v1817_v20 }
  0x55   :  { %1007 = vmatprep.mubr.bf16.mxu1 %v1824_v21 }
  0x5a   :  { %911 = vmatmul.mubr.bf16.gmra.mrb[28].mxu0 %v1821_v22 }
  0x5b   :  { %1048 = vmatprep.mubr.bf16.mxu0 %v1831_v23 }
  0x5c   :  { %1008 = vmatmul.mubr.bf16.gmra.mrb[28].mxu1 %v1827_v24 }
  0x5d   :  { %1710 = vmatprep.mubr.bf16.mxu1 %v1833_v25 }
  0x62   :  { %1049 = vmatmul.mubr.bf16.vlgmr.msra.gmra.mrb[32].mxu0 %v1829_v26 }
  0x63   :  { %1056 = vmatprep.mubr.bf16.mxu0 %v1835_v27 }
  0x64   :  { %1711 = vmatmul.mubr.bf16.vlgmr.msra.gmra.mrb[32].mxu1 %v1834_v28 }
  0x65   :  { %1714 = vmatprep.mubr.bf16.mxu1 %v1841_v29 }
  0x6a   :  { %1057 = vmatmul.mubr.bf16.gmra.mrb[36].mxu0 %v1837_v30 }
  0x6b   :  { %1064 = vmatprep.mubr.bf16.mxu0 %v1838_v31 }
  0x6c   :  { %1715 = vmatmul.mubr.bf16.gmra.mrb[36].mxu1 %v1842_v32 }
  0x6d   :  { %1718 = vmatprep.mubr.bf16.mxu1 %v1849_v33 }
  0x72   :  { %1065 = vmatmul.mubr.bf16.gmra.mrb[40].mxu0 %v1840_v34 }
  0x73   :  { %1072 = vmatprep.mubr.bf16.mxu0 %v1843_v35 }
  0x74   :  { %1719 = vmatmul.mubr.bf16.gmra.mrb[40].mxu1 %v1850_v36 }
  0x75   :  { %1722 = vmatprep.mubr.bf16.mxu1 %v1857_v37 }
  0x7a   :  { %1073 = vmatmul.mubr.bf16.gmra.mrb[44].mxu0 %v1845_v38 }
  0x7b   :  { %1080 = vmatprep.mubr.bf16.mxu0 %v1846_v39 }
  0x7c   :  { %1723 = vmatmul.mubr.bf16.gmra.mrb[44].mxu1 %v1858_v40 }
  0x82   :  { %1081 = vmatmul.mubr.bf16.gmra.mrb[48].mxu0 %v1848_v41 }
  0x83   :  { %1088 = vmatprep.mubr.bf16.mxu0 %v1851_v42 }
  0x8a   :  { %1089 = vmatmul.mubr.bf16.gmra.mrb[52].mxu0 %v1853_v43 }
  0x8b   :  { %1096 = vmatprep.mubr.bf16.mxu0 %v1854_v44 }
  0x92   :  { %1097 = vmatmul.mubr.bf16.gmra.mrb[56].mxu0 %v1856_v45 }
  0x93   :  { %1104 = vmatprep.mubr.bf16.mxu0 %v1859_v46 }
  0x9a   :  { %1105 = vmatmul.mubr.bf16.gmra.mrb[60].mxu0 %v1861_v47 }
  0xf5   :  { %v1502_v48 = vpop.f32.mrb[0].mxu0 }
  0xf6   :  { %v1503_v50 = vpop.f32.mrb[1].mxu0 }
  0xf7   :  { %v1504_v51 = vadd.f32 %v1503_v50, %v1502_v48  ;;  %v1505_v52 = vpop.f32.mrb[2].mxu0  ;;  %v1566_v53 = vpop.f32.mrb[0].mxu1 }
  0xf8   :  { %v1506_v54 = vpop.f32.mrb[3].mxu0  ;;  %v1567_v57 = vpop.f32.mrb[1].mxu1 }
  0xf9   :  { %v857_v55 = vadd.f32 %v1504_v51, %v2221_v49  ;;  %v1507_v56 = vadd.f32 %v1506_v54, %v1505_v52  ;;  %v1568_v58 = vadd.f32 %v1567_v57, %v1566_v53  ;;  %v1569_v59 = vpop.f32.mrb[2].mxu1 }
  0xfa   :  { %v1570_v61 = vpop.f32.mrb[3].mxu1 }
  0xfb   :  { %v860_v60 = vadd.f32 %v1507_v56, %v2221_v49  ;;  %v2225_v62 = vadd.f32 %v1568_v58, %v857_v55  ;;  %v1571_v63 = vadd.f32 %v1570_v61, %v1569_v59 }
  0xfd   :  { %v1508_v0 = vpop.f32.mrb[4].mxu0  ;;  %v2227_v1 = vadd.f32 %v1571_v63, %v860_v60 }
  0xfe   :  { %v1509_v2 = vpop.f32.mrb[5].mxu0 }
  0xff   :  { %v1510_v3 = vadd.f32 %v1509_v2, %v1508_v0  ;;  %v1511_v4 = vpop.f32.mrb[6].mxu0  ;;  %v1572_v5 = vpop.f32.mrb[4].mxu1 }
 0x100   :  { %v1512_v6 = vpop.f32.mrb[7].mxu0  ;;  %v1573_v9 = vpop.f32.mrb[5].mxu1 }
 0x101   :  { %v865_v7 = vadd.f32 %v1510_v3, %v2221_v49  ;;  %v1513_v8 = vadd.f32 %v1512_v6, %v1511_v4  ;;  %v1574_v10 = vadd.f32 %v1573_v9, %v1572_v5  ;;  %v1575_v11 = vpop.f32.mrb[6].mxu1 }
 0x102   :  { %v1576_v13 = vpop.f32.mrb[7].mxu1 }
 0x103   :  { %v868_v12 = vadd.f32 %v1513_v8, %v2221_v49  ;;  %v2231_v14 = vadd.f32 %v1574_v10, %v865_v7  ;;  %v1577_v15 = vadd.f32 %v1576_v13, %v1575_v11 }
 0x105   :  { %v1514_v16 = vpop.f32.mrb[8].mxu0  ;;  %v2233_v17 = vadd.f32 %v1577_v15, %v868_v12 }
 0x106   :  { %v1515_v18 = vpop.f32.mrb[9].mxu0 }
 0x107   :  { %v1516_v19 = vadd.f32 %v1515_v18, %v1514_v16  ;;  %v1517_v20 = vpop.f32.mrb[10].mxu0  ;;  %v1578_v21 = vpop.f32.mrb[8].mxu1 }
 0x108   :  { %v1518_v22 = vpop.f32.mrb[11].mxu0  ;;  %v1579_v25 = vpop.f32.mrb[9].mxu1 }
 0x109   :  { %v873_v23 = vadd.f32 %v1516_v19, %v2221_v49  ;;  %v1519_v24 = vadd.f32 %v1518_v22, %v1517_v20  ;;  %v1580_v26 = vadd.f32 %v1579_v25, %v1578_v21  ;;  %v1581_v27 = vpop.f32.mrb[10].mxu1 }
 0x10a   :  { %v1582_v29 = vpop.f32.mrb[11].mxu1 }
 0x10b   :  { %v876_v28 = vadd.f32 %v1519_v24, %v2221_v49  ;;  %v2237_v30 = vadd.f32 %v1580_v26, %v873_v23  ;;  %v1583_v31 = vadd.f32 %v1582_v29, %v1581_v27 }
 0x10d   :  { %v1520_v32 = vpop.f32.mrb[12].mxu0  ;;  %v2239_v33 = vadd.f32 %v1583_v31, %v876_v28 }
 0x10e   :  { %v1521_v34 = vpop.f32.mrb[13].mxu0 }
 0x10f   :  { %v1522_v35 = vadd.f32 %v1521_v34, %v1520_v32  ;;  %v1523_v36 = vpop.f32.mrb[14].mxu0  ;;  %v1584_v37 = vpop.f32.mrb[12].mxu1 }
 0x110   :  { %v1524_v38 = vpop.f32.mrb[15].mxu0  ;;  %v1585_v41 = vpop.f32.mrb[13].mxu1 }
 0x111   :  { %v881_v39 = vadd.f32 %v1522_v35, %v2221_v49  ;;  %v1525_v40 = vadd.f32 %v1524_v38, %v1523_v36  ;;  %v1586_v42 = vadd.f32 %v1585_v41, %v1584_v37  ;;  %v1587_v43 = vpop.f32.mrb[14].mxu1 }
 0x112   :  { %v1588_v45 = vpop.f32.mrb[15].mxu1 }
 0x113   :  { %v884_v44 = vadd.f32 %v1525_v40, %v2221_v49  ;;  %v2243_v46 = vadd.f32 %v1586_v42, %v881_v39  ;;  %v1589_v47 = vadd.f32 %v1588_v45, %v1587_v43 }
 0x115   :  { %v1526_v48 = vpop.f32.mrb[16].mxu0  ;;  %v2245_v50 = vadd.f32 %v1589_v47, %v884_v44 }
 0x116   :  { %v1527_v51 = vpop.f32.mrb[17].mxu0 }
 0x117   :  { %v1528_v52 = vadd.f32 %v1527_v51, %v1526_v48  ;;  %v1529_v53 = vpop.f32.mrb[18].mxu0  ;;  %v1590_v54 = vpop.f32.mrb[16].mxu1 }
 0x118   :  { %v1530_v55 = vpop.f32.mrb[19].mxu0  ;;  %v1591_v58 = vpop.f32.mrb[17].mxu1 }
 0x119   :  { %v889_v56 = vadd.f32 %v1528_v52, %v2221_v49  ;;  %v1531_v57 = vadd.f32 %v1530_v55, %v1529_v53  ;;  %v1592_v59 = vadd.f32 %v1591_v58, %v1590_v54  ;;  %v1593_v60 = vpop.f32.mrb[18].mxu1 }
 0x11a   :  { %v1594_v63 = vpop.f32.mrb[19].mxu1 }
 0x11b   :  { %v892_v61 = vadd.f32 %v1531_v57, %v2221_v49  ;;  %v2249_v0 = vadd.f32 %v1592_v59, %v889_v56  ;;  %v1595_v2 = vadd.f32 %v1594_v63, %v1593_v60 }
 0x11d   :  { %v1532_v3 = vpop.f32.mrb[20].mxu0  ;;  %v2251_v4 = vadd.f32 %v1595_v2, %v892_v61 }
 0x11e   :  { %v1533_v5 = vpop.f32.mrb[21].mxu0 }
 0x11f   :  { %v1534_v6 = vadd.f32 %v1533_v5, %v1532_v3  ;;  %v1535_v7 = vpop.f32.mrb[22].mxu0  ;;  %v1596_v8 = vpop.f32.mrb[20].mxu1 }
 0x120   :  { %v1536_v9 = vpop.f32.mrb[23].mxu0  ;;  %v1597_v12 = vpop.f32.mrb[21].mxu1 }
 0x121   :  { %v897_v10 = vadd.f32 %v1534_v6, %v2221_v49  ;;  %v1537_v11 = vadd.f32 %v1536_v9, %v1535_v7  ;;  %v1598_v13 = vadd.f32 %v1597_v12, %v1596_v8  ;;  %v1599_v15 = vpop.f32.mrb[22].mxu1 }
 0x122   :  { %v1600_v18 = vpop.f32.mrb[23].mxu1 }
 0x123   :  { %v900_v16 = vadd.f32 %v1537_v11, %v2221_v49  ;;  %v2255_v19 = vadd.f32 %v1598_v13, %v897_v10  ;;  %v1601_v20 = vadd.f32 %v1600_v18, %v1599_v15 }
 0x125   :  { %v1538_v21 = vpop.f32.mrb[24].mxu0  ;;  %v2257_v22 = vadd.f32 %v1601_v20, %v900_v16 }
 0x126   :  { %v1539_v23 = vpop.f32.mrb[25].mxu0 }
 0x127   :  { %v1540_v24 = vadd.f32 %v1539_v23, %v1538_v21  ;;  %v1541_v25 = vpop.f32.mrb[26].mxu0  ;;  %v1602_v26 = vpop.f32.mrb[24].mxu1 }
 0x128   :  { %v1542_v27 = vpop.f32.mrb[27].mxu0  ;;  %v1603_v31 = vpop.f32.mrb[25].mxu1 }
 0x129   :  { %v905_v28 = vadd.f32 %v1540_v24, %v2221_v49  ;;  %v1543_v29 = vadd.f32 %v1542_v27, %v1541_v25  ;;  %v1604_v32 = vadd.f32 %v1603_v31, %v1602_v26  ;;  %v1605_v34 = vpop.f32.mrb[26].mxu1 }
 0x12a   :  { %v1606_v36 = vpop.f32.mrb[27].mxu1 }
 0x12b   :  { %v908_v35 = vadd.f32 %v1543_v29, %v2221_v49  ;;  %v2261_v37 = vadd.f32 %v1604_v32, %v905_v28  ;;  %v1607_v38 = vadd.f32 %v1606_v36, %v1605_v34 }
 0x12d   :  { %v1544_v39 = vpop.f32.mrb[28].mxu0  ;;  %v2263_v40 = vadd.f32 %v1607_v38, %v908_v35 }
 0x12e   :  { %v1545_v41 = vpop.f32.mrb[29].mxu0 }
 0x12f   :  { %v1546_v42 = vadd.f32 %v1545_v41, %v1544_v39  ;;  %v1547_v43 = vpop.f32.mrb[30].mxu0  ;;  %v1608_v44 = vpop.f32.mrb[28].mxu1 }
 0x130   :  { %v1548_v45 = vpop.f32.mrb[31].mxu0  ;;  %v1609_v51 = vpop.f32.mrb[29].mxu1 }
 0x131   :  { %v913_v47 = vadd.f32 %v1546_v42, %v2221_v49  ;;  %v1549_v48 = vadd.f32 %v1548_v45, %v1547_v43  ;;  %v1610_v52 = vadd.f32 %v1609_v51, %v1608_v44  ;;  %v1611_v53 = vpop.f32.mrb[30].mxu1 }
 0x132   :  { %v1612_v55 = vpop.f32.mrb[31].mxu1 }
 0x133   :  { %v916_v54 = vadd.f32 %v1549_v48, %v2221_v49  ;;  %v2267_v56 = vadd.f32 %v1610_v52, %v913_v47  ;;  %v1613_v57 = vadd.f32 %v1612_v55, %v1611_v53 }
 0x135   :  { %v1630_v58 = vpop.f32.mrb[32].mxu0  ;;  %v2269_v59 = vadd.f32 %v1613_v57, %v916_v54 }
 0x136   :  { %v1631_v60 = vpop.f32.mrb[33].mxu0 }
 0x137   :  { %v1632_v61 = vadd.f32 %v1631_v60, %v1630_v58  ;;  %v1633_v63 = vpop.f32.mrb[34].mxu0  ;;  %v1712_v3 = vpop.f32.mrb[32].mxu1 }
 0x138   :  { %v1634_v2 = vpop.f32.mrb[35].mxu0  ;;  %v1147_v7 = vpop.f32.mrb[33].mxu1 }
 0x139   :  { %v1635_v5 = vadd.f32 %v1634_v2, %v1633_v63  ;;  %v1051_v6 = vadd.f32 %v1632_v61, %v2225_v62  ;;  %v1713_v8 = vpop.f32.mrb[34].mxu1 }
 0x13a   :  { %v1150_v10 = vpop.f32.mrb[35].mxu1 }
 0x13b   :  { %v1148_v9 = vadd.f32 %v1147_v7, %v1051_v6  ;;  %v1054_v49 = vadd.f32 %v1635_v5, %v2227_v1 }
 0x13d   :  { %v1151_v11 = vadd.f32 %v1150_v10, %v1054_v49  ;;  %v1636_v12 = vpop.f32.mrb[36].mxu0 }
 0x13e   :  { %v1637_v13 = vpop.f32.mrb[37].mxu0 }
 0x13f   :  { %v1442_v15 = vpack.c.bf16 %v1151_v11, %v1148_v9  ;;  %v1638_v16 = vadd.f32 %v1637_v13, %v1636_v12  ;;  %v1639_v18 = vpop.f32.mrb[38].mxu0  ;;  %v1716_v21 = vpop.f32.mrb[36].mxu1 }
 0x140   :  { %v1640_v20 = vpop.f32.mrb[39].mxu0  ;;  %v1163_v24 = vpop.f32.mrb[37].mxu1 }
 0x141   :  { %1443 = vst [vmem:[%s2314_s3] sm:$0xff] %v1442_v15   ;;  %v1059_v62 = vadd.f32 %v1638_v16, %v2231_v14  ;;  %v1641_v23 = vadd.f32 %v1640_v20, %v1639_v18  ;;  %v1717_v25 = vpop.f32.mrb[38].mxu1 }
 0x142   :  { %v1166_v27 = vpop.f32.mrb[39].mxu1 }
 0x143   :  { %v1156_v26 = vadd.f32 %v1712_v3, %v1059_v62  ;;  %v1062_v1 = vadd.f32 %v1641_v23, %v2233_v17 }
 0x145   :  { %v1159_v28 = vadd.f32 %v1713_v8, %v1062_v1  ;;  %v1642_v29 = vpop.f32.mrb[40].mxu0 }
 0x146   :  { %v1643_v31 = vpop.f32.mrb[41].mxu0 }
 0x147   :  { %v1447_v32 = vpack.c.bf16 %v1159_v28, %v1156_v26  ;;  %v1644_v34 = vadd.f32 %v1643_v31, %v1642_v29  ;;  %v1645_v35 = vpop.f32.mrb[42].mxu0  ;;  %v1720_v38 = vpop.f32.mrb[40].mxu1 }
 0x148   :  { %v1646_v36 = vpop.f32.mrb[43].mxu0  ;;  %v1179_v41 = vpop.f32.mrb[41].mxu1 }
 0x149   :  { %1479 = vst [vmem:[%s2314_s3 + $0x8] sm:$0xff] %v1447_v32   ;;  %v1647_v14 = vadd.f32 %v1646_v36, %v1645_v35  ;;  %v1067_v39 = vadd.f32 %v1644_v34, %v2237_v30  ;;  %v1721_v42 = vpop.f32.mrb[42].mxu1 }
 0x14a   :  { %v1182_v44 = vpop.f32.mrb[43].mxu1 }
 0x14b   :  { %v1164_v43 = vadd.f32 %v1163_v24, %v1067_v39  ;;  %v1070_v17 = vadd.f32 %v1647_v14, %v2239_v33 }
 0x14d   :  { %v1167_v45 = vadd.f32 %v1166_v27, %v1070_v17  ;;  %v1648_v47 = vpop.f32.mrb[44].mxu0 }
 0x14e   :  { %v1649_v48 = vpop.f32.mrb[45].mxu0 }
 0x14f   :  { %v1452_v51 = vpack.c.bf16 %v1167_v45, %v1164_v43  ;;  %v1650_v52 = vadd.f32 %v1649_v48, %v1648_v47  ;;  %v1651_v53 = vpop.f32.mrb[46].mxu0  ;;  %v1724_v55 = vpop.f32.mrb[44].mxu1 }
 0x150   :  { %v1652_v54 = vpop.f32.mrb[47].mxu0  ;;  %v1195_v58 = vpop.f32.mrb[45].mxu1 }
 0x151   :  { %1480 = vst [vmem:[%s2314_s3 + $0x10] sm:$0xff] %v1452_v51   ;;  %v1075_v30 = vadd.f32 %v1650_v52, %v2243_v46  ;;  %v1653_v57 = vadd.f32 %v1652_v54, %v1651_v53  ;;  %v1725_v60 = vpop.f32.mrb[46].mxu1 }
 0x152   :  { %v1198_v63 = vpop.f32.mrb[47].mxu1 }
 0x153   :  { %v1172_v61 = vadd.f32 %v1716_v21, %v1075_v30  ;;  %v1078_v33 = vadd.f32 %v1653_v57, %v2245_v50 }
 0x155   :  { %v1175_v2 = vadd.f32 %v1717_v25, %v1078_v33  ;;  %v1654_v3 = vpop.f32.mrb[48].mxu0 }
 0x156   :  { %v1655_v5 = vpop.f32.mrb[49].mxu0 }
 0x157   :  { %v1457_v6 = vpack.c.bf16 %v1175_v2, %v1172_v61  ;;  %v1656_v7 = vadd.f32 %v1655_v5, %v1654_v3  ;;  %v1657_v8 = vpop.f32.mrb[50].mxu0 }
 0x158   :  { %v1658_v9 = vpop.f32.mrb[51].mxu0 }
 0x159   :  { %1481 = vst [vmem:[%s2314_s3 + $0x18] sm:$0xff] %v1457_v6   ;;  %v1659_v49 = vadd.f32 %v1658_v9, %v1657_v8  ;;  %v1083_v46 = vadd.f32 %v1656_v7, %v2249_v0 }
 0x15b   :  { %v1180_v10 = vadd.f32 %v1179_v41, %v1083_v46  ;;  %v1086_v11 = vadd.f32 %v1659_v49, %v2251_v4 }
 0x15d   :  { %v1183_v12 = vadd.f32 %v1182_v44, %v1086_v11  ;;  %v1660_v50 = vpop.f32.mrb[52].mxu0 }
 0x15e   :  { %v1661_v13 = vpop.f32.mrb[53].mxu0 }
 0x15f   :  { %v1462_v15 = vpack.c.bf16 %v1183_v12, %v1180_v10  ;;  %v1662_v16 = vadd.f32 %v1661_v13, %v1660_v50  ;;  %v1663_v18 = vpop.f32.mrb[54].mxu0 }
 0x160   :  { %v1664_v20 = vpop.f32.mrb[55].mxu0 }
 0x161   :  { %1482 = vst [vmem:[%s2314_s3 + $0x20] sm:$0xff] %v1462_v15   ;;  %v1091_v21 = vadd.f32 %v1662_v16, %v2255_v19  ;;  %v1665_v62 = vadd.f32 %v1664_v20, %v1663_v18 }
 0x163   :  { %v1188_v23 = vadd.f32 %v1720_v38, %v1091_v21  ;;  %v1094_v0 = vadd.f32 %v1665_v62, %v2257_v22 }
 0x165   :  { %v1191_v24 = vadd.f32 %v1721_v42, %v1094_v0  ;;  %v1666_v25 = vpop.f32.mrb[56].mxu0 }
 0x166   :  { %v1667_v4 = vpop.f32.mrb[57].mxu0 }
 0x167   :  { %v1467_v26 = vpack.c.bf16 %v1191_v24, %v1188_v23  ;;  %v1668_v1 = vadd.f32 %v1667_v4, %v1666_v25  ;;  %v1669_v27 = vpop.f32.mrb[58].mxu0 }
 0x168   :  { %v1670_v28 = vpop.f32.mrb[59].mxu0 }
 0x169   :  { %1483 = vst [vmem:[%s2314_s3 + $0x28] sm:$0xff] %v1467_v26   ;;  %v1671_v29 = vadd.f32 %v1670_v28, %v1669_v27  ;;  %v1099_v31 = vadd.f32 %v1668_v1, %v2261_v37 }
 0x16b   :  { %v1196_v32 = vadd.f32 %v1195_v58, %v1099_v31  ;;  %v1102_v19 = vadd.f32 %v1671_v29, %v2263_v40 }
 0x16d   :  { %v1199_v34 = vadd.f32 %v1198_v63, %v1102_v19  ;;  %v1672_v35 = vpop.f32.mrb[60].mxu0 }
 0x16e   :  { %v1673_v22 = vpop.f32.mrb[61].mxu0 }
 0x16f   :  { %v1472_v36 = vpack.c.bf16 %v1199_v34, %v1196_v32  ;;  %v1674_v38 = vadd.f32 %v1673_v22, %v1672_v35  ;;  %v1675_v14 = vpop.f32.mrb[62].mxu0 }
 0x170   :  { %v1676_v39 = vpop.f32.mrb[63].mxu0 }
 0x171   :  { %1484 = vst [vmem:[%s2314_s3 + $0x30] sm:$0xff] %v1472_v36   ;;  %v1107_v41 = vadd.f32 %v1674_v38, %v2267_v56  ;;  %v1677_v42 = vadd.f32 %v1676_v39, %v1675_v14 }
 0x173   :  { %v1204_v43 = vadd.f32 %v1724_v55, %v1107_v41  ;;  %v1110_v37 = vadd.f32 %v1677_v42, %v2269_v59 }
 0x175   :  { %v1207_v17 = vadd.f32 %v1725_v60, %v1110_v37 }
 0x177   :  { %v1477_v44 = vpack.c.bf16 %v1207_v17, %v1204_v43 }
 0x179   :  { %1485 = vst [vmem:[%s2314_s3 + $0x38] sm:$0xff] %v1477_v44  }

</bundles_post_ra>
